<compile_context>
chip_gen: v5e
topology: v5e:2x2
jax: 0.10.0
libtpu: 0.0.40
codegen_flags: <defaults>
</compile_context>

<pallas_src>
import functools

import jax
import jax.numpy as jnp
from jax.experimental import pallas as pl
from jax.experimental.pallas import tpu as pltpu

EPS = 1e-5    # module eps
_LANES = 128  # vreg lane width
_SUB = 8      # preferred sublane fold factor


def _logit_kernel(x_ref, y_ref, ld_ref, acc_ref, *, valid_cols):
    """Elementwise logit + per-row log-det accumulation over feature tiles."""
    j = pl.program_id(1)                 # feature / reduction axis ("arbitrary")
    last = pl.num_programs(1) - 1

    x = jnp.clip(x_ref[...].astype(jnp.float32), EPS, 1.0 - EPS)
    log_x = jnp.log(x)
    log_1mx = jnp.log1p(-x)

    # logit(x) = log(x) - log(1 - x)
    y_ref[...] = (log_x - log_1mx).astype(y_ref.dtype)

    # log|d logit/dx| = -(log(x) + log(1-x))  (== 2*softplus(logit x) - logit x)
    log_det = -(log_x + log_1mx)

    tr, tc = x_ref.shape

    @pl.when(j == 0)
    def _():
        acc_ref[...] = jnp.zeros_like(acc_ref)

    def lane_fold(v):
        # lane-dense partial sums: 128-wide VPU adds only; the single
        # cross-lane reduce happens once per row tile in the finalize branch.
        p = v[:, 0:_LANES]
        for s in range(1, tc // _LANES):
            p = p + v[:, s * _LANES:(s + 1) * _LANES]
        return p

    if valid_cols % tc != 0:
        # Ragged feature count: only the last tile has out-of-bounds lanes, so
        # the masking cost is paid on that single tile.
        @pl.when(j != last)
        def _():
            acc_ref[...] += lane_fold(log_det)

        @pl.when(j == last)
        def _():
            col = jax.lax.broadcasted_iota(jnp.int32, (tr, tc), 1) + j * tc
            acc_ref[...] += lane_fold(jnp.where(col < valid_cols, log_det, 0.0))
    else:
        acc_ref[...] += lane_fold(log_det)

    @pl.when(j == last)
    def _():
        ld_ref[...] = jnp.sum(acc_ref[...], axis=1, keepdims=True)


def _round_up(n, m):
    return -(-n // m) * m


@jax.jit
def logit_forward(x, log_df_dz):
    """x: (B, ...) values in (0, 1); log_df_dz: (B,)."""
    B = x.shape[0]
    D = 1
    for s in x.shape[1:]:
        D *= s

    # Fold features onto the sublane axis with a divisor of D so the reshape is
    # a free contiguous view: (B, D) -> (B*fold, D//fold). No padding copies.
    fold = 1
    for f in (_SUB, 4, 2):
        if D % f == 0:
            fold = f
            break
    R = B * fold
    dcp = D // fold
    x_f = x.reshape(R, dcp)

    # Feature tile: lane-aligned, ceil-div grid (masked last tile when ragged).
    tc = min(2048, _round_up(dcp, _LANES))
    # Row tile: sublane-aligned; prefer >= 2 row tiles so the "parallel" axis
    # can be sharded across both v7x TensorCores.  Block <= ~2 MiB f32 so the
    # double-buffered in+out windows fit default scoped VMEM on all gens.
    if R < 8:
        tr = R                       # block equals full row extent (legal)
    else:
        half = (R // 2) // 8 * 8
        tr = max(8, min(256, half))
    grid = (pl.cdiv(R, tr), pl.cdiv(dcp, tc))

    kernel = functools.partial(_logit_kernel, valid_cols=dcp)

    y_f, ld_rows = pl.pallas_call(
        kernel,
        out_shape=(
            jax.ShapeDtypeStruct((R, dcp), x.dtype),
            jax.ShapeDtypeStruct((R, 1), jnp.float32),
        ),
        grid_spec=pltpu.PrefetchScalarGridSpec(
            num_scalar_prefetch=0,
            grid=grid,
            in_specs=[
                pl.BlockSpec((tr, tc), lambda i, j: (i, j)),
            ],
            out_specs=[
                pl.BlockSpec((tr, tc), lambda i, j: (i, j)),
                pl.BlockSpec((tr, 1), lambda i, j: (i, 0)),  # resident over j
            ],
            scratch_shapes=[pltpu.VMEM((tr, _LANES), jnp.float32)],
        ),
        compiler_params=pltpu.CompilerParams(
            dimension_semantics=("parallel", "arbitrary"),
        ),
    )(x_f)

    # Finish: fold the sub-rows back to one log-det per batch element.
    logdet = jnp.sum(ld_rows.reshape(B, fold), axis=1)
    y = y_f.reshape(x.shape)
    return y, log_df_dz + logdet


def _reference(x, log_df_dz):
    """Pure-JAX reference mirroring the PyTorch forward (softplus form)."""
    xc = jnp.clip(x, EPS, 1.0 - EPS)
    y = jnp.log(xc) - jnp.log1p(-xc)
    log_det = 2.0 * jnp.logaddexp(y, 0.0) - y
    log_det = jnp.sum(log_det.reshape(x.shape[0], -1), axis=1)
    return y, log_df_dz + log_det


if __name__ == "__main__":
    key = jax.random.PRNGKey(0)
    kx, kl = jax.random.split(key)

    B, C, H, W = 2, 4, 16, 16
    # inputs in (0, 1) like the data a Logit flow layer expects
    x = jax.random.uniform(kx, (B, C, H, W), dtype=jnp.float32,
                           minval=0.0, maxval=1.0)
    log_df_dz = jax.random.normal(kl, (B,), dtype=jnp.float32)

    y, ldz = logit_forward(x, log_df_dz)
    jax.block_until_ready((y, ldz))

    y_ref, ldz_ref = _reference(x, log_df_dz)
    assert jnp.allclose(y, y_ref, atol=1e-4, rtol=1e-4)
    assert jnp.allclose(ldz, ldz_ref, atol=1e-2, rtol=1e-4)

    print("KERNEL_OK")
</pallas_src>

<mosaic_0001>
module attributes {stable_mosaic.version = 11 : i64} {
  func.func @_logit_kernel(%arg0: i32, %arg1: i32, %arg2: memref<8x128xf32, #tpu.memory_space<vmem>>, %arg3: memref<8x128xf32, #tpu.memory_space<vmem>>, %arg4: memref<8x1xf32, #tpu.memory_space<vmem>>, %arg5: memref<8x128xf32, #tpu.memory_space<vmem>>) attributes {dimension_semantics = [#tpu.dimension_semantics<parallel>, #tpu.dimension_semantics<arbitrary>], iteration_bounds = array<i64: 2, 1>, scalar_prefetch = 0 : i64, scratch_operands = 1 : i64, tpu.core_type = #tpu.core_type<tc>, window_params = [{transform_indices = @transform_0, window_bounds = array<i64: 8, 128>}, {transform_indices = @transform_1, window_bounds = array<i64: 8, 128>}, {transform_indices = @transform_2, window_bounds = array<i64: 8, 1>}]} {
    %c0 = arith.constant 0 : index
    %c0_0 = arith.constant 0 : index
    %0 = vector.load %arg2[%c0, %c0_0] : memref<8x128xf32, #tpu.memory_space<vmem>>, vector<8x128xf32>
    %cst = arith.constant 9.99999974E-6 : f32
    %cst_1 = arith.constant 0.999989986 : f32
    %1 = vector.broadcast %cst : f32 to vector<8x128xf32>
    %2 = arith.maximumf %1, %0 : vector<8x128xf32>
    %3 = vector.broadcast %cst_1 : f32 to vector<8x128xf32>
    %4 = arith.minimumf %3, %2 : vector<8x128xf32>
    %5 = math.log %4 : vector<8x128xf32>
    %cst_2 = arith.constant 0.000000e+00 : f32
    %6 = vector.broadcast %cst_2 : f32 to vector<8x128xf32>
    %7 = arith.subf %6, %4 : vector<8x128xf32>
    %8 = math.log1p %7 : vector<8x128xf32>
    %9 = arith.subf %5, %8 : vector<8x128xf32>
    %c0_3 = arith.constant 0 : index
    %c0_4 = arith.constant 0 : index
    %10 = vector.load %arg3[%c0_3, %c0_4] : memref<8x128xf32, #tpu.memory_space<vmem>>, vector<8x128xf32>
    tpu.vector_store %arg3[%c0_3, %c0_4], %9 {strides = array<i32>} : memref<8x128xf32, #tpu.memory_space<vmem>>, vector<8x128xf32>,
    %11 = arith.addf %5, %8 : vector<8x128xf32>
    %cst_5 = arith.constant 0.000000e+00 : f32
    %12 = vector.broadcast %cst_5 : f32 to vector<8x128xf32>
    %13 = arith.subf %12, %11 : vector<8x128xf32>
    %c0_i32 = arith.constant 0 : i32
    %14 = arith.cmpi eq, %arg1, %c0_i32 : i32
    %15 = arith.extui %14 : i1 to i32
    %c0_i32_6 = arith.constant 0 : i32
    %16 = arith.cmpi ne, %15, %c0_i32_6 : i32
    scf.if %16 {
      %cst_13 = arith.constant 0.000000e+00 : f32
      %23 = vector.broadcast %cst_13 : f32 to vector<8x128xf32>
      %c0_14 = arith.constant 0 : index
      %c0_15 = arith.constant 0 : index
      %24 = vector.load %arg5[%c0_14, %c0_15] : memref<8x128xf32, #tpu.memory_space<vmem>>, vector<8x128xf32>
      tpu.vector_store %arg5[%c0_14, %c0_15], %23 {strides = array<i32>} : memref<8x128xf32, #tpu.memory_space<vmem>>, vector<8x128xf32>,
    } else {
    }
    %c0_7 = arith.constant 0 : index
    %c0_8 = arith.constant 0 : index
    %17 = vector.load %arg5[%c0_7, %c0_8] : memref<8x128xf32, #tpu.memory_space<vmem>>, vector<8x128xf32>
    %18 = arith.addf %17, %13 : vector<8x128xf32>
    %c0_9 = arith.constant 0 : index
    %c0_10 = arith.constant 0 : index
    %19 = vector.load %arg5[%c0_9, %c0_10] : memref<8x128xf32, #tpu.memory_space<vmem>>, vector<8x128xf32>
    tpu.vector_store %arg5[%c0_9, %c0_10], %18 {strides = array<i32>} : memref<8x128xf32, #tpu.memory_space<vmem>>, vector<8x128xf32>,
    %c0_i32_11 = arith.constant 0 : i32
    %20 = arith.cmpi eq, %arg1, %c0_i32_11 : i32
    %21 = arith.extui %20 : i1 to i32
    %c0_i32_12 = arith.constant 0 : i32
    %22 = arith.cmpi ne, %21, %c0_i32_12 : i32
    scf.if %22 {
      %c0_13 = arith.constant 0 : index
      %c0_14 = arith.constant 0 : index
      %23 = vector.load %arg5[%c0_13, %c0_14] : memref<8x128xf32, #tpu.memory_space<vmem>>, vector<8x128xf32>
      %cst_15 = arith.constant dense<0.000000e+00> : vector<8xf32>
      %24 = vector.multi_reduction <add>, %23, %cst_15 [1] : vector<8x128xf32> to vector<8xf32>
      %25 = vector.shape_cast %24 : vector<8xf32> to vector<8x1xf32>
      %c0_16 = arith.constant 0 : index
      %c0_17 = arith.constant 0 : index
      %26 = vector.load %arg4[%c0_16, %c0_17] : memref<8x1xf32, #tpu.memory_space<vmem>>, vector<8x1xf32>
      tpu.vector_store %arg4[%c0_16, %c0_17], %25 {strides = array<i32>} : memref<8x1xf32, #tpu.memory_space<vmem>>, vector<8x1xf32>,
    } else {
    }
    return
  }
  func.func @transform_0(%arg0: i32, %arg1: i32) -> (i32, i32) {
    %c0_i32 = arith.constant 0 : i32
    return %arg0, %arg1 : i32, i32
  }
  func.func @transform_1(%arg0: i32, %arg1: i32) -> (i32, i32) {
    %c0_i32 = arith.constant 0 : i32
    return %arg0, %arg1 : i32, i32
  }
  func.func @transform_2(%arg0: i32, %arg1: i32) -> (i32, i32) {
    %c0_i32 = arith.constant 0 : i32
    %c0_i32_0 = arith.constant 0 : i32
    return %arg0, %c0_i32 : i32, i32
  }
}

</mosaic_0001>

<bundles_post_ra>
// kernel: logit_forward.1
= control target key start
LH: loop header
LB: loop body
LE: loop exit
PB: predicated region body
PF: predicated region fallthrough
CT: control target
= control target key end

     0   :  { %s398_s9 = smov 0   ;;  %s400_s10 = smov 0   ;;  %s434_s0 = inlined_call_operand.vmem [shape: f32[16,128], index: 0, kind: input, shape index: {}]   ;;  %s435_s1 = inlined_call_operand.vmem [shape: f32[16,128], index: 1, kind: output, shape index: {0}]   ;;  %s436_s2 = inlined_call_operand.vmem [shape: f32[16,1], index: 2, kind: output, shape index: {1}]  }
   0x1   :  { %s402_s11 = smov 0  }
   0x2 LB: > { %s25_s12 = sadd.s32 1, %s377_s10  ;;  %p325_p0 = scmp.ge.s32.totalorder %s381_s11, 1  ;;  %s381_s11 = sphi %s402_s11, %s13_s11   ;;  %s377_s10 = sphi %s400_s10, %s438_s10   ;;  %s373_s9 = sphi %s398_s9, %s437_s9  }
   0x3   : > { %p27_p1 = scmp.ge.s32.totalorder %s25_s12, 2  ;;  %p133_p2 = scmp.lt.s32.totalorder %s381_s11, 3 }
   0x5   : > { %s440_s12 = smov (%p27_p1, %s25_s12), 0  ;;  %p134_p3 = pnand %p325_p0, %p133_p2 }
   0x6   : > { %p163_p4 = scmp.lt.s32.totalorder (!%p134_p3), %s373_s9, 1 }
   0x7   : > { %137 = sbr.rel (%p134_p3) target bundleno = 155 (0x9b), region = 24 }
   0xc   : > { %s442_s9 = smov (!%p163_p4, %s373_s9), 1  ;;  %vm214_vm1 = vcmask 7168  }
   0xd   : > { %s326_s13 = sshll.u32 %s442_s9, 3 }
   0xe   : > { %s169_s16 = scalar_lea.vmem %s434_s0, %s326_s13  ;;  %s176_s19 = scalar_lea.vmem %s435_s1, %s326_s13 }
   0xf   : > { %v181_v0 = vld [vmem:[%s169_s16] sm:$0xff]  ;;  %s180_s22 = scalar_lea.vmem %s436_s2, %s326_s13 }
  0x10   : > { %v182_v1 = vmax.f32 %v181_v0, 1e-05 }
  0x12   : > { %v183_v2 = vmin.f32 %v182_v1, 0.99999 }
  0x14   : > { %v186_v3 = vsub.f32 0.0, %v183_v2  ;;  %355 = vlog2.f32 %v183_v2 }
  0x16   : > { %v187_v4 = vadd.f32 1.0, %v186_v3  ;;  %v190_v5 = vmul.f32 -0.5, %v186_v3  ;;  %v193_v7 = vand.u32 2147483647, %v186_v3 }
  0x18   : > { %357 = vlog2.f32 %v187_v4  ;;  %v191_v6 = vadd.f32 1.0, %v190_v5  ;;  %vm194_vm0 = vcmp.lt.f32.partialorder %v193_v7, 0.0004427343 }
  0x1a   : > { %v356_v8 = vpop.eup %355  ;;  %v192_v9 = vmul.f32 %v191_v6, %v186_v3 }
  0x1b   : > { %v185_v11 = vmul.f32 0.6931472, %v356_v8 }
  0x1e   : > { %v358_v10 = vpop.eup %357 }
  0x1f   : > { %v189_v12 = vmul.f32 0.6931472, %v358_v10 }
  0x21   : > { %v195_v13 = vsel %vm194_vm0, %v192_v9, %v189_v12 }
  0x22   : > { %v196_v14 = vsub.f32 %v185_v11, %v195_v13  ;;  %v198_v15 = vadd.f32 %v195_v13, %v185_v11 }
  0x24   : > { %197 = vst [vmem:[%s176_s19] sm:$0xff] %v196_v14  ;;  %v199_v16 = vsub.f32 0.0, %v198_v15 }
  0x26   : > { %212 = vadd.xlane.f32.xlu0 %v199_v16 }
  0x99   : > { %v213_v17 = vpop.xlane.xlu0 %212 }
  0x9a   : > { %215 = vst.msk [vmem:[%s180_s22] sm:$0xff] %vm214_vm1, %v213_v17 }
  0x9b PF: > { %s13_s11 = sadd.s32 1, %s381_s11   ;;  %s437_s9 = smov %s377_s10 }
  0x9c   : > { %p10_p5 = scmp.ge.s32.totalorder %s13_s11, 4   ;;  %s438_s10 = smov %s440_s12 }
  0x9e   :  { %12 = sbr.rel (!%p10_p5) target bundleno = 2 (0x2), region = 74 }

</bundles_post_ra>
